<compile_context>
chip_gen: v6e
topology: v6e:2x2x1
jax: 0.10.0
libtpu: 0.0.40
codegen_flags: <defaults>
</compile_context>

<pallas_src>
import functools

import jax
import jax.numpy as jnp
from jax.experimental import pallas as pl
from jax.experimental.pallas import tpu as pltpu

_LANE = 128  # f32 vreg lane width


def _round8(n):
    return ((n + 7) // 8) * 8


def _layouts(F, S, H, d_hid, d_out):
    """Static row offsets inside the two packed parameter buffers."""
    assert H <= _LANE and S <= _LANE and d_hid <= _LANE and d_out <= d_hid
    gate = {"w_row": 0, "b_row": _round8(F)}           # weights rows [0:F], bias row
    gate["rows"] = _round8(gate["b_row"] + 1)
    head = {"w1h": 0}                                   # (_LANE, d_hid), rows [0:H] real
    head["w1s"] = _LANE                                 # (S, d_hid)
    head["b1"] = _round8(head["w1s"] + S)               # (1, d_hid)
    head["w2"] = _round8(head["b1"] + 1)                # (d_hid, d_out) in cols [0:d_out]
    head["b2"] = head["w2"] + _round8(d_hid)            # (1, d_out)
    head["rows"] = _round8(head["b2"] + 1)
    return gate, head


def pack_params(torch_params, *, F, S, H, d_hid, d_out):
    """Pack PyTorch-layout DynamicNN parameters into two contiguous f32
    buffers.  Runs ONCE at parameter-prep time, outside the per-call path."""
    w_ih = torch_params["lstm.weight_ih_l0"]                       # (4H, F)
    b = torch_params["lstm.bias_ih_l0"] + torch_params["lstm.bias_hh_l0"]  # (4H,)
    w1 = torch_params["head.0.weight"]                             # (d_hid, H+S)
    b1 = torch_params["head.0.bias"]                               # (d_hid,)
    w2 = torch_params["head.2.weight"]                             # (d_out, d_hid)
    b2 = torch_params["head.2.bias"]                               # (d_out,)

    # Guards (review): the t=0-only elision needs zero initial (h, c) and a
    # single-layer LSTM; the W1 split hard-codes concat order ["lstm","state"].
    assert w_ih.shape == (4 * H, F), "expected single-layer LSTM weight_ih_l0"
    assert "lstm.weight_ih_l1" not in torch_params, "stacked LSTM not supported"
    assert w1.shape == (d_hid, H + S), "head concat order must be [lstm, state]"

    gate_l, head_l = _layouts(F, S, H, d_hid, d_out)

    # Gate pack: (rows, 3*128). PyTorch gate order along 4H is i, f, g, o; the
    # f gate is dropped (f * c_prev == 0). Each used gate gets its own
    # 128-lane block (zeros elsewhere) so in-kernel slices are vreg-aligned.
    w_ih_t = jnp.asarray(w_ih, jnp.float32).T                      # (F, 4H)
    gate_pack = jnp.zeros((gate_l["rows"], 3 * _LANE), jnp.float32)
    for blk, g in enumerate((0, 2, 3)):                            # blocks [i | g | o]
        lo = blk * _LANE
        gate_pack = gate_pack.at[0:F, lo:lo + H].set(w_ih_t[:, g * H:(g + 1) * H])
        gate_pack = gate_pack.at[gate_l["b_row"], lo:lo + H].set(b[g * H:(g + 1) * H])

    # Head pack: (rows, d_hid). concat([h, state]) @ W1 == h@W1_h + state@W1_s.
    w1_t = jnp.asarray(w1, jnp.float32).T                          # (H+S, d_hid)
    head_pack = jnp.zeros((head_l["rows"], d_hid), jnp.float32)
    head_pack = head_pack.at[head_l["w1h"]:head_l["w1h"] + H, :].set(w1_t[:H, :])
    head_pack = head_pack.at[head_l["w1s"]:head_l["w1s"] + S, :].set(w1_t[H:, :])
    head_pack = head_pack.at[head_l["b1"], :].set(b1)
    head_pack = head_pack.at[head_l["w2"]:head_l["w2"] + d_hid, 0:d_out].set(
        jnp.asarray(w2, jnp.float32).T)
    head_pack = head_pack.at[head_l["b2"], 0:d_out].set(b2)
    return gate_pack, head_pack


# ----------------------------------------------------------------------------
# Fused kernel: LSTM(t=0 step) -> concat(lstm, state) -> Linear/ReLU/Linear.
# ----------------------------------------------------------------------------
def _fused_kernel(asset_ref, state_ref, gate_ref, head_ref, o_ref,
                  *, F, S, d_hid, d_out, gate_l, head_l):
    # ---- LSTM, t = 0 step only (h_prev = c_prev = 0) ----
    x0 = asset_ref[:, 0, :]                                     # (B, F)
    wg = gate_ref[0:F, :]                                       # (F, 3*128): [i|g|o]
    bg = gate_ref[gate_l["b_row"]:gate_l["b_row"] + 1, :]       # (1, 3*128)
    gates = jnp.dot(x0, wg, preferred_element_type=jnp.float32) + bg   # (B, 3*128)

    # vreg-aligned 128-lane gate blocks: full-vreg elementwise, no masked
    # sub-slices, no rolls.  Pad lanes: sigmoid(0)=0.5, tanh(0)=0.
    i_blk = jax.nn.sigmoid(gates[:, 0 * _LANE:1 * _LANE])       # sigma(i) | 0.5 pad
    g_blk = jnp.tanh(gates[:, 1 * _LANE:2 * _LANE])             # tanh(g)  | 0   pad
    o_blk = jax.nn.sigmoid(gates[:, 2 * _LANE:3 * _LANE])       # sigma(o) | 0.5 pad
    c_blk = i_blk * g_blk                    # c0 in lanes [0:H]; pad lanes exactly 0
    h_blk = o_blk * jnp.tanh(c_blk)          # h0 = output[:, 0, :] in [0:H]; pad 0

    # ---- head: concat([h0, state], dim=1) -> Linear -> ReLU -> Linear ----
    w1h = head_ref[head_l["w1h"]:head_l["w1h"] + _LANE, :]      # (128, d_hid) padded
    w1s = head_ref[head_l["w1s"]:head_l["w1s"] + S, :]          # (S, d_hid)
    b1 = head_ref[head_l["b1"]:head_l["b1"] + 1, :]             # (1, d_hid)
    w2 = head_ref[head_l["w2"]:head_l["w2"] + d_hid, 0:d_out]   # (d_hid, d_out)
    b2 = head_ref[head_l["b2"]:head_l["b2"] + 1, 0:d_out]       # (1, d_out)

    # TODO(synk): profile folding state into lanes [H:H+S] of h_blk (its junk
    #             lanes are exactly 0) to merge these two dots into one push.
    hid = (jnp.dot(h_blk, w1h, preferred_element_type=jnp.float32)
           + jnp.dot(state_ref[...], w1s, preferred_element_type=jnp.float32)
           + b1)
    hid = jnp.maximum(hid, 0.0)                                 # ReLU
    o_ref[...] = jnp.dot(hid, w2, preferred_element_type=jnp.float32) + b2


@functools.partial(jax.jit, static_argnames=("H", "d_hid", "d_out"))
def fused_forward(asset, state, gate_pack, head_pack, *, H, d_hid, d_out):
    B, _, F = asset.shape
    S = state.shape[1]
    gate_l, head_l = _layouts(F, S, H, d_hid, d_out)
    kernel = functools.partial(_fused_kernel, F=F, S=S, d_hid=d_hid, d_out=d_out,
                               gate_l=gate_l, head_l=head_l)
    vmem = pl.BlockSpec(memory_space=pltpu.MemorySpace.VMEM)    # whole array -> VMEM
    return pl.pallas_call(
        kernel,
        out_shape=jax.ShapeDtypeStruct((B, d_out), jnp.float32),
        in_specs=[vmem, vmem, vmem, vmem],
        out_specs=vmem,
    )(asset, state, gate_pack, head_pack)


def dynamic_nn_forward(x_dict, packed, *, H, d_hid, d_out):
    """DynamicNN.forward for the instantiated config (one fused pallas_call)."""
    out = fused_forward(x_dict["asset"], x_dict["state"],
                        packed["gate_pack"], packed["head_pack"],
                        H=H, d_hid=d_hid, d_out=d_out)
    x_dict["head"] = out
    return x_dict["head"]                                       # output key = "head"


# ----------------------------------------------------------------------------
# Pure-JAX reference (full T-step recurrence, mirrors PyTorch exactly).
# ----------------------------------------------------------------------------
def reference_forward(x_dict, torch_params, *, H):
    P = jax.lax.Precision.HIGHEST
    x = x_dict["asset"]
    B, T, _ = x.shape
    w_ih = torch_params["lstm.weight_ih_l0"]
    w_hh = torch_params["lstm.weight_hh_l0"]
    b = torch_params["lstm.bias_ih_l0"] + torch_params["lstm.bias_hh_l0"]
    h = jnp.zeros((B, H), jnp.float32)
    c = jnp.zeros((B, H), jnp.float32)
    outs = []
    for t in range(T):
        g = (jnp.dot(x[:, t, :], w_ih.T, precision=P)
             + jnp.dot(h, w_hh.T, precision=P) + b)
        i = jax.nn.sigmoid(g[:, :H])
        f = jax.nn.sigmoid(g[:, H:2 * H])
        gg = jnp.tanh(g[:, 2 * H:3 * H])
        o = jax.nn.sigmoid(g[:, 3 * H:])
        c = f * c + i * gg
        h = o * jnp.tanh(c)
        outs.append(h)
    lstm_out0 = jnp.stack(outs, axis=1)[:, 0, :]                # PyTorch: x[0][:, 0, :]
    cat = jnp.concatenate([lstm_out0, x_dict["state"]], axis=1)
    hmid = jnp.maximum(jnp.dot(cat, torch_params["head.0.weight"].T, precision=P)
                       + torch_params["head.0.bias"], 0.0)
    return (jnp.dot(hmid, torch_params["head.2.weight"].T, precision=P)
            + torch_params["head.2.bias"])


if __name__ == "__main__":
    B, T, F, S, H = 2, 8, 8, 4, 32        # batch, seq, asset feats, state feats, hidden
    D_HID, D_OUT = 32, 8                  # head MLP sizes

    key = jax.random.PRNGKey(0)
    keys = jax.random.split(key, 10)

    # PyTorch-layout parameters, mirroring the module's init choices:
    # LSTM weight_ih xavier-normal, weight_hh orthogonal, biases uniform;
    # Linears xavier-normal weights, uniform(0,1) biases.
    xav_ih = (2.0 / (4 * H + F)) ** 0.5
    w_ih = jax.random.normal(keys[0], (4 * H, F), jnp.float32) * xav_ih
    w_hh, _ = jnp.linalg.qr(jax.random.normal(keys[1], (4 * H, H), jnp.float32))
    bound = 1.0 / (H ** 0.5)
    b_ih = jax.random.uniform(keys[2], (4 * H,), jnp.float32, -bound, bound)
    b_hh = jax.random.uniform(keys[3], (4 * H,), jnp.float32, -bound, bound)
    xav1 = (2.0 / (D_HID + H + S)) ** 0.5
    w1 = jax.random.normal(keys[4], (D_HID, H + S), jnp.float32) * xav1
    b1 = jax.random.uniform(keys[5], (D_HID,), jnp.float32)
    xav2 = (2.0 / (D_OUT + D_HID)) ** 0.5
    w2 = jax.random.normal(keys[6], (D_OUT, D_HID), jnp.float32) * xav2
    b2 = jax.random.uniform(keys[7], (D_OUT,), jnp.float32)

    torch_params = {
        "lstm.weight_ih_l0": w_ih, "lstm.weight_hh_l0": w_hh,
        "lstm.bias_ih_l0": b_ih, "lstm.bias_hh_l0": b_hh,
        "head.0.weight": w1, "head.0.bias": b1,
        "head.2.weight": w2, "head.2.bias": b2,
    }

    # One-time parameter packing (outside the per-call forward path).
    gate_pack, head_pack = pack_params(torch_params, F=F, S=S, H=H,
                                       d_hid=D_HID, d_out=D_OUT)
    packed = {"gate_pack": jax.block_until_ready(gate_pack),
              "head_pack": jax.block_until_ready(head_pack)}

    x_dict = {
        "asset": jax.random.normal(keys[8], (B, T, F), jnp.float32),
        "state": jax.random.normal(keys[9], (B, S), jnp.float32),
    }

    out = dynamic_nn_forward(dict(x_dict), packed, H=H, d_hid=D_HID, d_out=D_OUT)
    out = jax.block_until_ready(out)

    ref = reference_forward(dict(x_dict), torch_params, H=H)
    assert out.shape == (B, D_OUT)
    assert jnp.allclose(out, ref, atol=1e-4, rtol=1e-4), "mismatch vs reference"

    print("KERNEL_OK")
</pallas_src>

<mosaic_0001>
module attributes {stable_mosaic.version = 11 : i64} {
  func.func @_fused_kernel(%arg0: memref<2x8x8xf32, #tpu.memory_space<vmem>>, %arg1: memref<2x4xf32, #tpu.memory_space<vmem>>, %arg2: memref<16x384xf32, #tpu.memory_space<vmem>>, %arg3: memref<184x32xf32, #tpu.memory_space<vmem>>, %arg4: memref<2x8xf32, #tpu.memory_space<vmem>>) attributes {dimension_semantics = [], scalar_prefetch = 0 : i64, scratch_operands = 0 : i64, tpu.core_type = #tpu.core_type<tc>} {
    %c0 = arith.constant 0 : index
    %c0_0 = arith.constant 0 : index
    %c0_1 = arith.constant 0 : index
    %0 = vector.load %arg0[%c0, %c0_0, %c0_1] : memref<2x8x8xf32, #tpu.memory_space<vmem>>, vector<2x1x8xf32>
    %1 = vector.shape_cast %0 : vector<2x1x8xf32> to vector<2x8xf32>
    %c0_2 = arith.constant 0 : index
    %c0_3 = arith.constant 0 : index
    %2 = vector.load %arg2[%c0_2, %c0_3] : memref<16x384xf32, #tpu.memory_space<vmem>>, vector<8x384xf32>
    %c8 = arith.constant 8 : index
    %c0_4 = arith.constant 0 : index
    %3 = vector.load %arg2[%c8, %c0_4] : memref<16x384xf32, #tpu.memory_space<vmem>>, vector<1x384xf32>
    %cst = arith.constant dense<0.000000e+00> : vector<2x384xf32>
    %4 = tpu.matmul %1, %2, %cst {dimension_numbers = #tpu.dot_dimension_numbers<[1], [0], [0], [1], [0, 0, 1, 1], [], []>} : vector<2x8xf32>, vector<8x384xf32>, vector<2x384xf32> -> vector<2x384xf32>
    %5 = vector.broadcast %3 : vector<1x384xf32> to vector<2x384xf32>
    %6 = arith.addf %4, %5 : vector<2x384xf32>
    %7 = vector.extract_strided_slice %6 {offsets = [0, 0], sizes = [2, 128], strides = [1, 1]} : vector<2x384xf32> to vector<2x128xf32>
    %8 = arith.negf %7 : vector<2x128xf32>
    %9 = math.exp %8 : vector<2x128xf32>
    %cst_5 = arith.constant 1.000000e+00 : f32
    %10 = vector.broadcast %cst_5 : f32 to vector<2x128xf32>
    %11 = arith.addf %10, %9 : vector<2x128xf32>
    %12 = arith.divf %10, %11 : vector<2x128xf32>
    %13 = vector.extract_strided_slice %6 {offsets = [0, 128], sizes = [2, 128], strides = [1, 1]} : vector<2x384xf32> to vector<2x128xf32>
    %14 = math.tanh %13 : vector<2x128xf32>
    %15 = vector.extract_strided_slice %6 {offsets = [0, 256], sizes = [2, 128], strides = [1, 1]} : vector<2x384xf32> to vector<2x128xf32>
    %16 = arith.negf %15 : vector<2x128xf32>
    %17 = math.exp %16 : vector<2x128xf32>
    %cst_6 = arith.constant 1.000000e+00 : f32
    %18 = vector.broadcast %cst_6 : f32 to vector<2x128xf32>
    %19 = arith.addf %18, %17 : vector<2x128xf32>
    %20 = arith.divf %18, %19 : vector<2x128xf32>
    %21 = arith.mulf %12, %14 : vector<2x128xf32>
    %22 = math.tanh %21 : vector<2x128xf32>
    %23 = arith.mulf %20, %22 : vector<2x128xf32>
    %c0_7 = arith.constant 0 : index
    %c0_8 = arith.constant 0 : index
    %24 = vector.load %arg3[%c0_7, %c0_8] : memref<184x32xf32, #tpu.memory_space<vmem>>, vector<128x32xf32>
    %c128 = arith.constant 128 : index
    %c0_9 = arith.constant 0 : index
    %25 = vector.load %arg3[%c128, %c0_9] : memref<184x32xf32, #tpu.memory_space<vmem>>, vector<4x32xf32>
    %c136 = arith.constant 136 : index
    %c0_10 = arith.constant 0 : index
    %26 = vector.load %arg3[%c136, %c0_10] : memref<184x32xf32, #tpu.memory_space<vmem>>, vector<1x32xf32>
    %c144 = arith.constant 144 : index
    %c0_11 = arith.constant 0 : index
    %27 = vector.load %arg3[%c144, %c0_11] : memref<184x32xf32, #tpu.memory_space<vmem>>, vector<32x8xf32>
    %c176 = arith.constant 176 : index
    %c0_12 = arith.constant 0 : index
    %28 = vector.load %arg3[%c176, %c0_12] : memref<184x32xf32, #tpu.memory_space<vmem>>, vector<1x8xf32>
    %cst_13 = arith.constant dense<0.000000e+00> : vector<2x32xf32>
    %29 = tpu.matmul %23, %24, %cst_13 {dimension_numbers = #tpu.dot_dimension_numbers<[1], [0], [0], [1], [0, 0, 1, 1], [], []>} : vector<2x128xf32>, vector<128x32xf32>, vector<2x32xf32> -> vector<2x32xf32>
    %c0_14 = arith.constant 0 : index
    %c0_15 = arith.constant 0 : index
    %30 = vector.load %arg1[%c0_14, %c0_15] : memref<2x4xf32, #tpu.memory_space<vmem>>, vector<2x4xf32>
    %cst_16 = arith.constant dense<0.000000e+00> : vector<2x32xf32>
    %31 = tpu.matmul %30, %25, %cst_16 {dimension_numbers = #tpu.dot_dimension_numbers<[1], [0], [0], [1], [0, 0, 1, 1], [], []>} : vector<2x4xf32>, vector<4x32xf32>, vector<2x32xf32> -> vector<2x32xf32>
    %32 = arith.addf %29, %31 : vector<2x32xf32>
    %33 = vector.broadcast %26 : vector<1x32xf32> to vector<2x32xf32>
    %34 = arith.addf %32, %33 : vector<2x32xf32>
    %cst_17 = arith.constant 0.000000e+00 : f32
    %35 = vector.broadcast %cst_17 : f32 to vector<2x32xf32>
    %36 = arith.maximumf %34, %35 : vector<2x32xf32>
    %cst_18 = arith.constant dense<0.000000e+00> : vector<2x8xf32>
    %37 = tpu.matmul %36, %27, %cst_18 {dimension_numbers = #tpu.dot_dimension_numbers<[1], [0], [0], [1], [0, 0, 1, 1], [], []>} : vector<2x32xf32>, vector<32x8xf32>, vector<2x8xf32> -> vector<2x8xf32>
    %38 = vector.broadcast %28 : vector<1x8xf32> to vector<2x8xf32>
    %39 = arith.addf %37, %38 : vector<2x8xf32>
    %c0_19 = arith.constant 0 : index
    %c0_20 = arith.constant 0 : index
    %40 = vector.load %arg4[%c0_19, %c0_20] : memref<2x8xf32, #tpu.memory_space<vmem>>, vector<2x8xf32>
    tpu.vector_store %arg4[%c0_19, %c0_20], %39 {strides = array<i32>} : memref<2x8xf32, #tpu.memory_space<vmem>>, vector<2x8xf32>,
    return
  }
}

</mosaic_0001>

<bundles_post_ra>
// kernel: fused_forward.1
= control target key start
LH: loop header
LB: loop body
LE: loop exit
PB: predicated region body
PF: predicated region fallthrough
CT: control target
= control target key end

     0   :  { %v607_v2 = vmov 0.0   ;;  %vm44_vm0 = vcmask 1041409   ;;  %vm46_vm1 = vcmask 64512   ;;  %vm608_vm2 = vmmov 0   ;;  %s759_s0 = inlined_call_operand.vmem [shape: f32[2,8,8], index: 0, kind: input, shape index: {}]   ;;  %s760_s1 = inlined_call_operand.vmem [shape: f32[2,4], index: 1, kind: input, shape index: {}]   ;;  %s761_s2 = inlined_call_operand.vmem [shape: f32[16,384], index: 2, kind: input, shape index: {}]   ;;  %s762_s3 = inlined_call_operand.vmem [shape: f32[184,32], index: 3, kind: input, shape index: {}]   ;;  %s763_s4 = inlined_call_operand.hbm [shape: f32[2,8], index: 4, kind: output, shape index: {}]  }
   0x1   :  { %v21_v0 = vld [vmem:[%s761_s2 + $0x8] sm:$0xff]  ;;  %v20_v1 = vld [vmem:[%s761_s2] sm:$0xff]  ;;  %113 = vmatprep.mubr.f32.mxu0 %v607_v2  ;;  %524 = vmatprep.subr.mxu1 %v607_v2  ;;  %v22_v6 = vld [vmem:[%s761_s2 + $0x10] sm:$0xff] }
   0x2   :  { %79 = vmatprep.subr.mxu0 %v21_v0  ;;  %v18_v3 = vld [vmem:[%s759_s0] sm:$0x1]  ;;  %v19_v4 = vld [vmem:[%s759_s0 + $0x8] sm:$0x1]  ;;  %556 = vmatprep.mubr.msk.f32.mxu1 %vm608_vm2, %v607_v2 }
   0x3   :  { %80 = vmatpush1.msra.mxu0 %v20_v1  ;;  %v43_v5 = vrot.slane %v19_v4, 7 }
   0x4   :  { %514 = vmatprep.subr.mxu0 %v607_v2 }
   0x5   :  { %9 = vsyncpa [#allocation3], 0  ;;  %v45_v7 = vsel %vm44_vm0, %v43_v5, %v18_v3  ;;  %v221_v8 = vld [vmem:[%s762_s3 + $0x78] sm:$0xff]  ;;  %v220_v9 = vld [vmem:[%s762_s3 + $0x70] sm:$0xff]  ;;  %vm234_vm3 = vcmask 1043456   ;;  %vm230_vm4 = vcmask 31744   ;;  %v26_v26 = vlaneseq }
   0x6   :  { %479 = vmatmul.mubr.msk.f32.vlgmr.msra.gmra.mxu0 %vm46_vm1, %v45_v7  ;;  %525 = vmatpush3.msra.mxu1 %v221_v8  ;;  %v219_v10 = vld [vmem:[%s762_s3 + $0x68] sm:$0xff]  ;;  %v218_v11 = vld [vmem:[%s762_s3 + $0x60] sm:$0xff]  ;;  %v217_v12 = vld [vmem:[%s762_s3 + $0x58] sm:$0xff]  ;;  %vm388_vm5 = vcmask 261120   ;;  %s609_s19 = smov [#allocation2]   ;;  %vm462_vm6 = vcmask 58368  }
   0x7   :  { %515 = vmatpush3.msra.mxu0 %v22_v6  ;;  %516 = vmatprep.mubr.msk.f32.mxu0 %vm608_vm2, %v607_v2  ;;  %v216_v13 = vld [vmem:[%s762_s3 + $0x50] sm:$0xff]  ;;  %v215_v14 = vld [vmem:[%s762_s3 + $0x48] sm:$0xff]  ;;  %v214_v15 = vld [vmem:[%s762_s3 + $0x40] sm:$0xff]  ;;  %v27_v27 = vshrl.u32 %v26_v26, 7  ;;  %s470_s20 = sshll.u32 %s609_s19, 4  ;;  %s471_s20 = int_to_ptr.vmem [resolvable:$true] %s470_s20 }
   0x8   :  { %519 = vmatprep.subr.mxu0 %v607_v2  ;;  %526 = vmatprep.subr.mxu1 %v607_v2  ;;  %v213_v16 = vld [vmem:[%s762_s3 + $0x38] sm:$0xff]  ;;  %v212_v17 = vld [vmem:[%s762_s3 + $0x30] sm:$0xff]  ;;  %v222_v18 = vld [vmem:[%s762_s3 + $0x80] sm:$0xf]  ;;  %s585_s21 = scalar_lea.vmem %s471_s20, 32  ;;  %p590_p1 = scmp.lt.s32.totalorder %s471_s20, %s471_s20 }
   0x9   :  { %527 = vmatpush3.msra.mxu1 %v220_v9  ;;  %v229_v19 = vld [vmem:[%s760_s1] sm:$0x3]  ;;  %v211_v20 = vld [vmem:[%s762_s3 + $0x28] sm:$0xff]  ;;  %v209_v22 = vld [vmem:[%s762_s3 + $0x18] sm:$0xff]  ;;  %v28_v28 = vsub.s32 0, %v27_v27  ;;  %v36_v31 = vsub.s32 2, %v27_v27  ;;  %p586_p0 = scmp.ne.s32.totalorder %s471_s20, %s585_s21  ;;  %p591_p2 = scmp.lt.s32.totalorder %s585_s21, %s585_s21 }
   0xa   :  { %517 = vmatmul.mubr.msk.f32.vlgmr.msra.gmra.mxu0 %vm46_vm1, %v45_v7  ;;  %528 = vmatprep.subr.mxu1 %v607_v2  ;;  %v210_v21 = vld [vmem:[%s762_s3 + $0x20] sm:$0xff]  ;;  %v208_v23 = vld [vmem:[%s762_s3 + $0x10] sm:$0xff]  ;;  %v207_v24 = vld [vmem:[%s762_s3 + $0x8] sm:$0xff]  ;;  %v32_v40 = vsub.s32 1, %v27_v27 }
   0xb   :  { %521 = vmatprep.mubr.msk.f32.mxu0 %vm608_vm2, %v607_v2  ;;  %529 = vmatpush3.msra.mxu1 %v219_v10  ;;  %v206_v25 = vld [vmem:[%s762_s3] sm:$0xff]  ;;  %v227_v56 = vld [vmem:[%s762_s3 + $0xa8] sm:$0xff]  ;;  %v225_v58 = vld [vmem:[%s762_s3 + $0x98] sm:$0xff]  ;;  %p592_p3 = por %p591_p2, %p590_p1 }
   0xc   :  { %530 = vmatprep.subr.mxu1 %v607_v2  ;;  %520 = vmatpush3.msk.msra.mxu0 %vm234_vm3, %v222_v18  ;;  %v478_v29 = vld [vmem:[%s761_s2 + $0x18] ss:$8 sm:$0x7]  ;;  %v224_v59 = vld [vmem:[%s762_s3 + $0x90] sm:$0xff] }
   0xd   :  { %531 = vmatpush3.msra.mxu1 %v218_v11  ;;  %559 = vmatprep.subr.mxu0 %v607_v2  ;;  %v29_v30 = vrot.slane %v478_v29, %v28_v28  ;;  %v37_v36 = vrot.slane %v478_v29, %v36_v31  ;;  %v33_v42 = vrot.slane %v478_v29, %v32_v40  ;;  %v226_v57 = vld [vmem:[%s762_s3 + $0xa0] sm:$0xff]  ;;  %v485_v60 = vld [vmem:[%s762_s3 + $0x88] ss:$0 sm:$0xff]  ;;  %v486_v3 = vld [vmem:[%s762_s3 + $0xb0] ss:$0 sm:$0xff]  ;;  %p593_p4 = pnand %p592_p3, %p586_p0 }
   0xe   :  { %532 = vmatprep.subr.mxu1 %v607_v2  ;;  %522 = vmatmul.mubr.msk.f32.vlgmr.msra.gmra.mxu0 %vm230_vm4, %v229_v19 }
   0xf   :  { %533 = vmatpush3.msra.mxu1 %v217_v12  ;;  %567 = vmatprep.mubr.msk.f32.mxu0 %vm608_vm2, %v607_v2 }
  0x10   :  { %534 = vmatprep.subr.mxu1 %v607_v2  ;;  %560 = vmatpush3.msra.mxu0 %v227_v56 }
  0x11   :  { %535 = vmatpush3.msra.mxu1 %v216_v13  ;;  %561 = vmatprep.subr.mxu0 %v607_v2 }
  0x12   :  { %536 = vmatprep.subr.mxu1 %v607_v2  ;;  %562 = vmatpush3.msra.mxu0 %v226_v57 }
  0x13   :  { %537 = vmatpush3.msra.mxu1 %v215_v14  ;;  %563 = vmatprep.subr.mxu0 %v607_v2 }
  0x14   :  { %538 = vmatprep.subr.mxu1 %v607_v2  ;;  %564 = vmatpush3.msra.mxu0 %v225_v58 }
  0x15   :  { %539 = vmatpush3.msra.mxu1 %v214_v15  ;;  %565 = vmatprep.subr.mxu0 %v607_v2 }
  0x16   :  { %540 = vmatprep.subr.mxu1 %v607_v2  ;;  %566 = vmatpush3.msra.mxu0 %v224_v59 }
  0x17   :  { %541 = vmatpush3.msra.mxu1 %v213_v16 }
  0x18   :  { %542 = vmatprep.subr.mxu1 %v607_v2 }
  0x19   :  { %543 = vmatpush3.msra.mxu1 %v212_v17 }
  0x1a   :  { %544 = vmatprep.subr.mxu1 %v607_v2 }
  0x1b   :  { %545 = vmatpush3.msra.mxu1 %v211_v20 }
  0x1c   :  { %546 = vmatprep.subr.mxu1 %v607_v2 }
  0x1d   :  { %547 = vmatpush3.msra.mxu1 %v210_v21 }
  0x1e   :  { %548 = vmatprep.subr.mxu1 %v607_v2 }
  0x1f   :  { %549 = vmatpush3.msra.mxu1 %v209_v22 }
  0x20   :  { %550 = vmatprep.subr.mxu1 %v607_v2 }
  0x21   :  { %551 = vmatpush3.msra.mxu1 %v208_v23 }
  0x22   :  { %552 = vmatprep.subr.mxu1 %v607_v2 }
  0x23   :  { %553 = vmatpush3.msra.mxu1 %v207_v24 }
  0x24   :  { %554 = vmatprep.subr.mxu1 %v607_v2 }
  0x25   :  { %555 = vmatpush3.msra.mxu1 %v206_v25 }
  0xc6   :  { %v115_v32 = vpop.f32.mrf.mxu0 }
  0xc7   :  { %v116_v33 = vadd.f32 %v115_v32, %v29_v30 }
  0xc8   :  { %v117_v34 = vpop.f32.mrf.mxu0 }
  0xc9   :  { %v481_v35 = vmul.f32 -1.442695, %v116_v33  ;;  %v118_v43 = vadd.f32 %v117_v34, %v33_v42 }
  0xca   :  { %v186_v37 = vpop.f32.mrf.mxu0 }
  0xcb   :  { %573 = vpow2.f32 %v481_v35  ;;  %v187_v39 = vadd.f32 %v186_v37, %v37_v36 }
  0xcc   :  { %v518_v38 = vpop.f32.mrf.mxu0 }
  0xcd   :  { %v482_v41 = vmul.f32 -1.442695, %v187_v39 }
  0xce   :  { %v304_v54 = vpop.f32.mrf.mxu0 }
  0xcf   :  { %575 = vpow2.f32 %v482_v41 }
  0xd0   :  { %577 = vtanh.f32 %v118_v43  ;;  %v523_v55 = vpop.f32.mrf.mxu0 }
  0xd8   :  { %v574_v44 = vpop.eup %573 }
  0xd9   :  { %v193_v45 = vadd.f32 1.0, %v574_v44 }
  0xdb   :  { %579 = vrcp.f32 %v193_v45 }
  0xdc   :  { %v576_v46 = vpop.eup %575 }
  0xdd   :  { %v200_v47 = vadd.f32 1.0, %v576_v46  ;;  %v578_v48 = vpop.eup %577 }
  0xdf   :  { %581 = vrcp.f32 %v200_v47 }
  0xe8   :  { %v580_v49 = vpop.eup %579 }
  0xe9   :  { %v203_v50 = vmul.f32 %v580_v49, %v578_v48 }
  0xeb   :  { %583 = vtanh.f32 %v203_v50 }
  0xec   :  { %v582_v51 = vpop.eup %581 }
  0xf8   :  { %v584_v52 = vpop.eup %583 }
  0xf9   :  { %v205_v53 = vmul.f32 %v584_v52, %v582_v51 }
  0xfb   :  { %557 = vmatmul.mubr.f32.vlgmr.msra.gmra.mxu1 %v205_v53 }
 0x1bb   :  { %v374_v61 = vpop.f32.mrf.mxu1 }
 0x1bc   :  { %v375_v62 = vadd.f32 %v374_v61, %v304_v54 }
 0x1bd   :  { %v558_v63 = vpop.f32.mrf.mxu1 }
 0x1be   :  { %v382_v0 = vadd.f32 %v485_v60, %v375_v62 }
 0x1c0   :  { %v383_v1 = vmax.f32 %v382_v0, 0.0 }
 0x1c2   :  { %568 = vmatmul.mubr.msk.f32.vlgmr.msra.gmra.mxu0 %vm388_vm5, %v383_v1 }
 0x282   :  { %v458_v4 = vpop.f32.mrf.mxu0 }
 0x283   :  { %v459_v2 = vadd.f32 %v486_v3, %v458_v4 }
 0x284   :  { %v569_v5 = vpop.f32.mrf.mxu0 }
 0x285   :  { %463 = vst.msk [vmem:[#allocation2] sm:$0x3] %vm462_vm6, %v459_v2 }
 0x286   :  { %596 = shalt.err (!%p593_p4)
}
 0x287   :  { %473 = dma.vmem_to_hbm [thread:$0]  %s471_s20, 32, %s763_s4, [#allocation3]  }
 0x288   :  { %605 = dma.done.wait [#allocation3], 32  }
 0x289   :  { %606 = vsyncadd [#allocation3], 4294967264 }
 0x28a   :  { %477 = vsyncpa [#allocation3], 1 }

</bundles_post_ra>
